<compile_context>
chip_gen: v7x
topology: tpu7x:2x2x1
jax: 0.10.0
libtpu: 0.0.40
codegen_flags: <defaults>
</compile_context>

<pallas_src>
import functools

import jax
import jax.numpy as jnp
from jax.experimental import pallas as pl
from jax.experimental.pallas import tpu as pltpu

EPS = 1e-08

_LANE = 128
_MIB = 1024 * 1024


@functools.lru_cache(maxsize=1)
def _vmem_limit_bytes():
    # Scoped VMEM limit: half the physical capacity, capped at 64 MiB.
    #   v5e / v6e (128 MiB physical) -> 64 MiB;  v7x (64 MiB physical) -> 32 MiB.
    try:
        cap = int(pltpu.get_tpu_info().vmem_capacity_bytes)
    except Exception:
        return 32 * _MIB
    return int(max(16 * _MIB, min(cap // 2, 64 * _MIB)))


def _round_up(x, m):
    return (x + m - 1) // m * m


def _cdiv(a, b):
    return (a + b - 1) // b


def _largest_divisor_leq(m, cap):
    best = 1
    for d in range(1, m + 1):
        if m % d == 0 and d <= cap:
            best = d
    return best


# ---------------------------------------------------------------------------
# Path 1: whole (TM, N, Kb) slab per grid step (small / medium slices).
# ---------------------------------------------------------------------------
def _gln_fused_kernel(y_ref, gamma_ref, beta_ref, o_ref, *, inv_count):
    # y_ref block: (TM, N, Kb); gamma/beta: (1, N, 1)
    y = y_ref[...].astype(jnp.float32)

    # Sublane (N) reduce first, then a single cross-lane (K) reduce per batch
    # row: TM XLU reductions per block instead of TM*N.
    s_k = jnp.sum(y, axis=1, keepdims=True)        # (TM, 1, Kb)   VPU-heavy
    sq_k = jnp.sum(y * y, axis=1, keepdims=True)   # (TM, 1, Kb)
    s = jnp.sum(s_k, axis=2, keepdims=True)        # (TM, 1, 1)    XLU (once/row)
    sq = jnp.sum(sq_k, axis=2, keepdims=True)      # (TM, 1, 1)

    mean = s * inv_count                            # (TM, 1, 1)
    var = jnp.maximum(sq * inv_count - mean * mean, 0.0)
    inv_std = jax.lax.rsqrt(var + EPS)

    gamma = gamma_ref[...].astype(jnp.float32)      # (1, N, 1)
    beta = beta_ref[...].astype(jnp.float32)        # (1, N, 1)

    # Hoisted per-channel affine; hot loop is one multiply-add per element.
    scale = gamma * inv_std                         # (TM, N, 1)
    shift = beta - mean * scale                     # (TM, N, 1)
    o_ref[...] = (y * scale + shift).astype(o_ref.dtype)


# ---------------------------------------------------------------------------
# Path 2: two-phase K-tiled kernel for slices too large for VMEM.
#   grid = (M, 2*nk):  t in [0, nk)   -> accumulate lane-shaped sum / sumsq
#                      t == nk        -> fold to scalars, hoist scale/shift
#                      t in [nk, 2nk) -> normalize + write K tile (t - nk)
# ---------------------------------------------------------------------------
def _gln_two_phase_kernel(y_ref, gamma_ref, beta_ref, o_ref,
                          sum_ref, sq_ref, scale_ref, shift_ref,
                          *, nk, tk, k_true, mask_tail, inv_count):
    t = pl.program_id(1)

    @pl.when(t == 0)
    def _():
        sum_ref[...] = jnp.zeros_like(sum_ref)
        sq_ref[...] = jnp.zeros_like(sq_ref)

    # Phase 1: lane-shaped partial sums (VPU adds only; phase is DMA-bound).
    @pl.when(t < nk)
    def _():
        y = y_ref[...].astype(jnp.float32)               # (1, N, tk)
        if mask_tail:
            col = t * tk + jax.lax.broadcasted_iota(jnp.int32, y.shape, 2)
            y = jnp.where(col < k_true, y, 0.0)          # ragged last tile
        sum_ref[...] += jnp.sum(y, axis=1)               # (1, tk) sublane reduce
        sq_ref[...] += jnp.sum(y * y, axis=1)

    # Phase transition: one cross-lane reduce per batch, hoist affine constants.
    @pl.when(t == nk)
    def _():
        mean = jnp.sum(sum_ref[...]) * inv_count
        var = jnp.maximum(jnp.sum(sq_ref[...]) * inv_count - mean * mean, 0.0)
        inv_std = jax.lax.rsqrt(var + EPS)
        gamma = gamma_ref[...].astype(jnp.float32)       # (1, N, 1)
        beta = beta_ref[...].astype(jnp.float32)
        scale_ref[...] = gamma * inv_std
        shift_ref[...] = beta - mean * scale_ref[...]

    # Phase 2: one multiply-add per element (OOB tail columns are dropped by
    # Pallas on the boundary-block writeback).
    @pl.when(t >= nk)
    def _():
        y = y_ref[...].astype(jnp.float32)
        o_ref[...] = (y * scale_ref[...] + shift_ref[...]).astype(o_ref.dtype)


# ---------------------------------------------------------------------------
# Wrapper
# ---------------------------------------------------------------------------
def global_layer_norm(y, gamma, beta, *, force_two_phase=False, max_tile_k=None):
    """y: [M, N, K]; gamma/beta: [1, N, 1]. Returns gLN(y) with y's dtype."""
    M, N, K = y.shape
    inv_count = 1.0 / float(N * K)                 # true (unpadded) element count
    itemsize = jnp.dtype(y.dtype).itemsize

    vmem_limit = _vmem_limit_bytes()
    # Per-step f32 block budget: 2x input + 2x output double buffers + ~2 f32
    # temporaries -> keep the per-block f32 slab under ~1/8 of the scoped limit.
    block_budget = vmem_limit // 8

    # Lane-dense width used for VMEM budgeting (K < 128 gets padded to 128).
    kb = K if K >= _LANE else _LANE
    small_fits = (N * kb * 4) <= block_budget

    flops = 5 * M * N * K
    transcendentals = M

    if small_fits and not force_two_phase:
        # ---------------- single-pass, M-batched path (2 HBM sweeps) ----------------
        pad = K < _LANE
        kp = _LANE if pad else K
        y_in = jnp.pad(y, ((0, 0), (0, 0), (0, kp - K))) if pad else y

        max_tm_vmem = max(1, block_budget // (N * kp * 4))
        max_tm_steps = max(1, M // 4)   # keep >= ~4 grid steps for DMA/compute overlap
        tm = _largest_divisor_leq(M, max(1, min(max_tm_vmem, max_tm_steps)))
        grid = (M // tm,)

        kernel = functools.partial(_gln_fused_kernel, inv_count=inv_count)
        cost = pl.CostEstimate(
            flops=flops,
            transcendentals=transcendentals,
            bytes_accessed=(2 * M * N * K + 2 * N) * itemsize,
        )
        out = pl.pallas_call(
            kernel,
            out_shape=jax.ShapeDtypeStruct((M, N, kp), y.dtype),
            grid_spec=pltpu.PrefetchScalarGridSpec(
                num_scalar_prefetch=0,
                grid=grid,
                in_specs=[
                    pl.BlockSpec((tm, N, kp), lambda m: (m, 0, 0)),
                    pl.BlockSpec((1, N, 1), lambda m: (0, 0, 0)),
                    pl.BlockSpec((1, N, 1), lambda m: (0, 0, 0)),
                ],
                out_specs=pl.BlockSpec((tm, N, kp), lambda m: (m, 0, 0)),
            ),
            compiler_params=pltpu.CompilerParams(
                dimension_semantics=("parallel",),
                vmem_limit_bytes=vmem_limit,
            ),
            cost_estimate=cost,
        )(y_in, gamma, beta)
        if pad:
            out = out[:, :, :K]
        return out

    # ---------------- two-phase K-tiled path (3 HBM sweeps, no wrapper pad) ----------------
    # TODO(synk): no N-tiling; assumes N * 128 * 4 bytes fits in a VMEM block
    # (true for typical channel counts in this model).
    tk = max(_LANE, (block_budget // (N * 4)) // _LANE * _LANE)
    if max_tile_k is not None:
        tk = min(tk, max(_LANE, (max_tile_k // _LANE) * _LANE))
    tk = min(tk, _round_up(K, _LANE))
    nk = _cdiv(K, tk)
    mask_tail = (K % tk) != 0
    grid = (M, 2 * nk)

    kernel = functools.partial(
        _gln_two_phase_kernel,
        nk=nk, tk=tk, k_true=K, mask_tail=mask_tail, inv_count=inv_count,
    )
    cost = pl.CostEstimate(
        flops=flops,
        transcendentals=transcendentals,
        bytes_accessed=(3 * M * N * K + 2 * N) * itemsize,
    )
    out = pl.pallas_call(
        kernel,
        out_shape=jax.ShapeDtypeStruct((M, N, K), y.dtype),
        grid_spec=pltpu.PrefetchScalarGridSpec(
            num_scalar_prefetch=0,
            grid=grid,
            in_specs=[
                pl.BlockSpec((1, N, tk), lambda m, t: (m, 0, t % nk)),
                pl.BlockSpec((1, N, 1), lambda m, t: (0, 0, 0)),
                pl.BlockSpec((1, N, 1), lambda m, t: (0, 0, 0)),
            ],
            out_specs=pl.BlockSpec(
                (1, N, tk), lambda m, t: (m, 0, jnp.maximum(t - nk, 0))
            ),
            scratch_shapes=[
                pltpu.VMEM((1, tk), jnp.float32),    # lane-shaped running sum
                pltpu.VMEM((1, tk), jnp.float32),    # lane-shaped running sum of squares
                pltpu.VMEM((1, N, 1), jnp.float32),  # hoisted scale = gamma * inv_std
                pltpu.VMEM((1, N, 1), jnp.float32),  # hoisted shift = beta - mean*scale
            ],
        ),
        compiler_params=pltpu.CompilerParams(
            dimension_semantics=("parallel", "arbitrary"),
            vmem_limit_bytes=vmem_limit,
        ),
        cost_estimate=cost,
    )(y, gamma, beta)
    return out


def reference_gln(y, gamma, beta):
    # Pure-JAX reference matching the PyTorch forward exactly.
    mean = jnp.mean(jnp.mean(y, axis=1, keepdims=True), axis=2, keepdims=True)
    var = jnp.mean(
        jnp.mean((y - mean) ** 2, axis=1, keepdims=True), axis=2, keepdims=True
    )
    return gamma * (y - mean) / jnp.power(var + EPS, 0.5) + beta


if __name__ == "__main__":
    key = jax.random.PRNGKey(0)
    k1, k2, k3, k4, k5 = jax.random.split(key, 5)

    # --- path 1, K < 128: lane-padded in the wrapper, sliced back ---
    M, N, K = 2, 4, 16  # batch, channel_size, length
    y = jax.random.normal(k1, (M, N, K), dtype=jnp.float32)
    gamma = 1.0 + 0.1 * jax.random.normal(k2, (1, N, 1), dtype=jnp.float32)
    beta = 0.1 * jax.random.normal(k3, (1, N, 1), dtype=jnp.float32)

    out = jax.block_until_ready(global_layer_norm(y, gamma, beta))
    ref = reference_gln(y, gamma, beta)
    assert out.shape == (M, N, K)
    assert jnp.allclose(out, ref, atol=1e-5, rtol=1e-5), "path-1 (padded) mismatch"

    # --- path 1, K >= 128 and not a multiple of 128: unpadded, M-batched grid ---
    M1, N1, K1 = 8, 6, 200
    y1 = jax.random.normal(k4, (M1, N1, K1), dtype=jnp.float32)
    gamma1 = 1.0 + 0.1 * jax.random.normal(k2, (1, N1, 1), dtype=jnp.float32)
    beta1 = 0.1 * jax.random.normal(k3, (1, N1, 1), dtype=jnp.float32)

    out1 = jax.block_until_ready(global_layer_norm(y1, gamma1, beta1))
    ref1 = reference_gln(y1, gamma1, beta1)
    assert out1.shape == (M1, N1, K1)
    assert jnp.allclose(out1, ref1, atol=1e-5, rtol=1e-5), "path-1 (unpadded) mismatch"

    # --- path 2: two-phase K-tiled fallback, forced small; ragged last K tile ---
    M2, N2, K2 = 2, 8, 200
    y2 = jax.random.normal(k5, (M2, N2, K2), dtype=jnp.float32)
    gamma2 = jnp.ones((1, N2, 1), dtype=jnp.float32)
    beta2 = jnp.zeros((1, N2, 1), dtype=jnp.float32)

    out2 = jax.block_until_ready(
        global_layer_norm(y2, gamma2, beta2, force_two_phase=True, max_tile_k=128)
    )
    ref2 = reference_gln(y2, gamma2, beta2)
    assert out2.shape == (M2, N2, K2)
    assert jnp.allclose(out2, ref2, atol=1e-5, rtol=1e-5), "two-phase path mismatch"

    print("KERNEL_OK")
</pallas_src>

<mosaic_0001>
module attributes {stable_mosaic.version = 11 : i64} {
  func.func @_gln_fused_kernel(%arg0: i32, %arg1: memref<1x4x128xf32, #tpu.memory_space<vmem>>, %arg2: memref<1x4x1xf32, #tpu.memory_space<vmem>>, %arg3: memref<1x4x1xf32, #tpu.memory_space<vmem>>, %arg4: memref<1x4x128xf32, #tpu.memory_space<vmem>>) attributes {dimension_semantics = [#tpu.dimension_semantics<parallel>], iteration_bounds = array<i64: 2>, scalar_prefetch = 0 : i64, scratch_operands = 0 : i64, tpu.core_type = #tpu.core_type<tc>, window_params = [{transform_indices = @transform_0, window_bounds = array<i64: 1, 4, 128>}, {pipeline_mode = #tpu.pipeline_mode<synchronous>, transform_indices = @transform_1, window_bounds = array<i64: 1, 4, 1>}, {pipeline_mode = #tpu.pipeline_mode<synchronous>, transform_indices = @transform_2, window_bounds = array<i64: 1, 4, 1>}, {transform_indices = @transform_3, window_bounds = array<i64: 1, 4, 128>}]} {
    %c0 = arith.constant 0 : index
    %c0_0 = arith.constant 0 : index
    %c0_1 = arith.constant 0 : index
    %0 = vector.load %arg1[%c0, %c0_0, %c0_1] : memref<1x4x128xf32, #tpu.memory_space<vmem>>, vector<1x4x128xf32>
    %cst = arith.constant dense<0.000000e+00> : vector<1x128xf32>
    %1 = vector.multi_reduction <add>, %0, %cst [1] : vector<1x4x128xf32> to vector<1x128xf32>
    %2 = vector.shape_cast %1 : vector<1x128xf32> to vector<1x1x128xf32>
    %3 = arith.mulf %0, %0 : vector<1x4x128xf32>
    %cst_2 = arith.constant dense<0.000000e+00> : vector<1x128xf32>
    %4 = vector.multi_reduction <add>, %3, %cst_2 [1] : vector<1x4x128xf32> to vector<1x128xf32>
    %5 = vector.shape_cast %4 : vector<1x128xf32> to vector<1x1x128xf32>
    %cst_3 = arith.constant dense<0.000000e+00> : vector<1x1xf32>
    %6 = vector.multi_reduction <add>, %2, %cst_3 [2] : vector<1x1x128xf32> to vector<1x1xf32>
    %7 = vector.shape_cast %6 : vector<1x1xf32> to vector<1x1x1xf32>
    %cst_4 = arith.constant dense<0.000000e+00> : vector<1x1xf32>
    %8 = vector.multi_reduction <add>, %5, %cst_4 [2] : vector<1x1x128xf32> to vector<1x1xf32>
    %9 = vector.shape_cast %8 : vector<1x1xf32> to vector<1x1x1xf32>
    %cst_5 = arith.constant 1.562500e-02 : f32
    %10 = vector.broadcast %cst_5 : f32 to vector<1x1x1xf32>
    %11 = arith.mulf %7, %10 : vector<1x1x1xf32>
    %cst_6 = arith.constant 1.562500e-02 : f32
    %12 = vector.broadcast %cst_6 : f32 to vector<1x1x1xf32>
    %13 = arith.mulf %9, %12 : vector<1x1x1xf32>
    %14 = arith.mulf %11, %11 : vector<1x1x1xf32>
    %15 = arith.subf %13, %14 : vector<1x1x1xf32>
    %cst_7 = arith.constant 0.000000e+00 : f32
    %16 = vector.broadcast %cst_7 : f32 to vector<1x1x1xf32>
    %17 = arith.maximumf %15, %16 : vector<1x1x1xf32>
    %cst_8 = arith.constant 9.99999993E-9 : f32
    %18 = vector.broadcast %cst_8 : f32 to vector<1x1x1xf32>
    %19 = arith.addf %17, %18 : vector<1x1x1xf32>
    %20 = math.rsqrt %19 : vector<1x1x1xf32>
    %c0_9 = arith.constant 0 : index
    %c0_10 = arith.constant 0 : index
    %c0_11 = arith.constant 0 : index
    %21 = vector.load %arg2[%c0_9, %c0_10, %c0_11] : memref<1x4x1xf32, #tpu.memory_space<vmem>>, vector<1x4x1xf32>
    %c0_12 = arith.constant 0 : index
    %c0_13 = arith.constant 0 : index
    %c0_14 = arith.constant 0 : index
    %22 = vector.load %arg3[%c0_12, %c0_13, %c0_14] : memref<1x4x1xf32, #tpu.memory_space<vmem>>, vector<1x4x1xf32>
    %23 = vector.broadcast %20 : vector<1x1x1xf32> to vector<1x4x1xf32>
    %24 = arith.mulf %21, %23 : vector<1x4x1xf32>
    %25 = vector.broadcast %11 : vector<1x1x1xf32> to vector<1x4x1xf32>
    %26 = arith.mulf %25, %24 : vector<1x4x1xf32>
    %27 = arith.subf %22, %26 : vector<1x4x1xf32>
    %28 = vector.broadcast %24 : vector<1x4x1xf32> to vector<1x4x128xf32>
    %29 = arith.mulf %0, %28 : vector<1x4x128xf32>
    %30 = vector.broadcast %27 : vector<1x4x1xf32> to vector<1x4x128xf32>
    %31 = arith.addf %29, %30 : vector<1x4x128xf32>
    %c0_15 = arith.constant 0 : index
    %c0_16 = arith.constant 0 : index
    %c0_17 = arith.constant 0 : index
    %32 = vector.load %arg4[%c0_15, %c0_16, %c0_17] : memref<1x4x128xf32, #tpu.memory_space<vmem>>, vector<1x4x128xf32>
    tpu.vector_store %arg4[%c0_15, %c0_16, %c0_17], %31 {strides = array<i32>} : memref<1x4x128xf32, #tpu.memory_space<vmem>>, vector<1x4x128xf32>,
    return
  }
  func.func @transform_0(%arg0: i32) -> (i32, i32, i32) {
    %c0_i32 = arith.constant 0 : i32
    %c0_i32_0 = arith.constant 0 : i32
    %c0_i32_1 = arith.constant 0 : i32
    return %arg0, %c0_i32, %c0_i32_0 : i32, i32, i32
  }
  func.func @transform_1(%arg0: i32) -> (i32, i32, i32) {
    %c0_i32 = arith.constant 0 : i32
    %c0_i32_0 = arith.constant 0 : i32
    %c0_i32_1 = arith.constant 0 : i32
    %c0_i32_2 = arith.constant 0 : i32
    return %c0_i32, %c0_i32_0, %c0_i32_1 : i32, i32, i32
  }
  func.func @transform_2(%arg0: i32) -> (i32, i32, i32) {
    %c0_i32 = arith.constant 0 : i32
    %c0_i32_0 = arith.constant 0 : i32
    %c0_i32_1 = arith.constant 0 : i32
    %c0_i32_2 = arith.constant 0 : i32
    return %c0_i32, %c0_i32_0, %c0_i32_1 : i32, i32, i32
  }
  func.func @transform_3(%arg0: i32) -> (i32, i32, i32) {
    %c0_i32 = arith.constant 0 : i32
    %c0_i32_0 = arith.constant 0 : i32
    %c0_i32_1 = arith.constant 0 : i32
    return %arg0, %c0_i32, %c0_i32_0 : i32, i32, i32
  }
}

</mosaic_0001>

<bundles_post_ra>
// kernel: tpu_custom_call.1
= control target key start
LH: loop header
LB: loop body
LE: loop exit
PB: predicated region body
PF: predicated region fallthrough
CT: control target
= control target key end

     0   :  { %8 = vsyncpa [#allocation3], 0  ;;  %s531_s0 = inlined_call_operand.vmem [shape: f32[2,4,128], index: 0, kind: input, shape index: {}]   ;;  %s532_s1 = inlined_call_operand.vmem [shape: f32[1,4,1], index: 1, kind: input, shape index: {}]   ;;  %s533_s2 = inlined_call_operand.vmem [shape: f32[1,4,1], index: 2, kind: input, shape index: {}]   ;;  %s534_s3 = inlined_call_operand.hbm [shape: f32[2,4,128], index: 3, kind: output, shape index: {}]  }
   0x1   :  { %10 = vsyncpa [#allocation3 + $0x1], 0  ;;  %s425_s12 = smov 0   ;;  %s427_s13 = smov 0  }
   0x2   :  { %s429_s14 = smov 0   ;;  %s431_s15 = smov 0  }
   0x3 LB: > { %s446_s16 = sadd.s32 4294967295, %s401_s15   ;;  %s285_s17 = sadd.s32 4294967294, %s401_s15   ;;  %s401_s15 = sphi %s431_s15, %s540_s15   ;;  %s397_s14 = sphi %s429_s14, %s539_s14   ;;  %s393_s13 = sphi %s427_s13, %s538_s13   ;;  %s389_s12 = sphi %s425_s12, %s537_s12  }
   0x4   : > { %s450_s18 = sadd.s32 1, %s401_s15   ;;  %s91_s19 = sadd.s32 1, %s397_s14 }
   0x5   : > { %s88_s20 = ssub.s32 %s401_s15, %s450_s18  ;;  %p101_p0 = scmp.ne.s32.totalorder %s397_s14, %s393_s13 }
   0x6   : > { %p89_p1 = scmp.eq.s32.totalorder %s88_s20, 0  ;;  %p102_p2 = scmp.eq.s32.totalorder %s446_s16, 1 }
   0x7   : > { %p107_p3 = scmp.ne.s32.totalorder %s393_s13, %s389_s12  ;;  %p108_p4 = scmp.eq.s32.totalorder %s285_s17, 1 }
   0x8   : > { %s461_s21 = scalar_select %p89_p1, %s397_s14, %s91_s19  }
   0x9   : > { %p463_p5 = por %p102_p2, %p101_p0  ;;  %p467_p6 = por %p108_p4, %p107_p3 }
   0xa   : > { %p288_p7 = scmp.ge.s32.totalorder %s401_s15, 1  ;;  %p139_p8 = scmp.lt.s32.totalorder %s401_s15, 3 }
   0xc   : > { %p140_p9 = pnand %p288_p7, %p139_p8 }
   0xd   : > { %p162_p10 = scmp.lt.s32.totalorder (!%p140_p9), %s446_s16, 1  ;;  %vm167_vm0 = vcmask (!%p140_p9), 1043456   ;;  %v403_v16 = vmov (!%p140_p9), 0   ;;  %v194_v25 = vld [vmem:[%s532_s1] sm:$0xf] (!%p140_p9)  ;;  %s159_s6 = sand.u32 (!%p140_p9), 1, %s393_s13  }
   0xe   : > { %143 = sbr.rel (%p140_p9) target bundleno = 354 (0x162), region = 32  ;;  %335 = vset.pattern.permute.xlu1 (!%p140_p9), %v403_v16  ;;  %336 = vset.pattern.permute.xlu0 (!%p140_p9), %v403_v16  ;;  %v195_v28 = vld [vmem:[%s533_s2] sm:$0xf] (!%p140_p9)  ;;  %s289_s7 = sshll.u32 (!%p140_p9), %s159_s6, 2 }
   0xf   : > { %s292_s8 = sshll.u32 (!%p140_p9), %s446_s16, 6  ;;  %s161_s9 = scalar_lea.vmem (!%p140_p9), [#allocation2], %s289_s7 }
  0x10   : > { %s226_s10 = sshll.u32 (!%p140_p9), %s161_s9, 4  ;;  %s489_s19 = scalar_lea.hbm (!%p140_p9), %s534_s3, %s292_s8  ;;  %s491_s10 = int_to_ptr.vmem [resolvable:$true] %s226_s10 }
  0x11   : > { %s213_s20 = scalar_lea.sflag (!%p140_p9), [#allocation3], %s159_s6 }
  0x15   : > { %s163_s24 = scalar_select %p162_p10, %s446_s16, 1 }
  0x16   : > { %s404_s16 = smov [#allocation2]  }
  0x17   : > { %s290_s25 = sshll.u32 %s163_s24, 2  ;;  %s339_s24 = scalar_lea.vmem %s491_s10, 64 }
  0x18   : > { %s165_s28 = scalar_lea.vmem %s531_s0, %s290_s25  ;;  %p340_p11 = scmp.ne.s32.totalorder %s491_s10, %s339_s24 }
  0x19   : > { %v166_v0 = vld [vmem:[%s165_s28] sm:$0xf]  ;;  %s343_s25 = sshll.u32 %s404_s16, 4  ;;  %s344_s25 = int_to_ptr.vmem [resolvable:$false] %s343_s25 }
  0x1a   : > { %v168_v1 = vsel %vm167_vm0, %v166_v0, 0.0  ;;  %v175_v2 = vmul.f32 %v166_v0, %v166_v0  ;;  %p341_p12 = pnand %p340_p11, %p463_p5  ;;  %s345_s26 = scalar_lea.vmem %s344_s25, 128 }
  0x1b   : > { %v169_v3 = vrot.slane %v168_v1, 4  ;;  %p346_p0 = scmp.lt.s32.totalorder %s491_s10, %s344_s25  ;;  %p347_p1 = scmp.lt.s32.totalorder %s345_s26, %s339_s24 }
  0x1c   : > { %v176_v4 = vsel %vm167_vm0, %v175_v2, 0.0  ;;  %p342_p13 = pneg %p341_p12 }
  0x1d   : > { %v170_v5 = vadd.f32 %v169_v3, %v168_v1  ;;  %v177_v6 = vrot.slane %v176_v4, 4  ;;  %p348_p2 = por %p347_p1, %p346_p0 }
  0x1f   : > { %v171_v7 = vrot.slane %v170_v5, 2  ;;  %v178_v8 = vadd.f32 %v177_v6, %v176_v4  ;;  %p349_p3 = pnand %p348_p2, %p342_p13 }
  0x21   : > { %v172_v9 = vadd.f32 %v171_v7, %v170_v5  ;;  %v179_v10 = vrot.slane %v178_v8, 2 }
  0x23   : > { %v173_v11 = vrot.slane %v172_v9, 1  ;;  %v180_v12 = vadd.f32 %v179_v10, %v178_v8 }
  0x25   : > { %v174_v13 = vadd.f32 %v173_v11, %v172_v9  ;;  %v181_v14 = vrot.slane %v180_v12, 1 }
  0x27   : > { %183 = vadd.xlane.f32.xlu0 %v174_v13  ;;  %v182_v15 = vadd.f32 %v181_v14, %v180_v12 }
  0x2b   : > { %185 = vadd.xlane.f32.xlu0 %v182_v15 }
  0xb4   : > { %v184_v17 = vpop.xlane.xlu0 %183 }
  0xb5   : > { %v187_v18 = vmul.f32 0.015625, %v184_v17 }
  0xb7   : > { %v189_v20 = vmul.f32 %v187_v18, %v187_v18 }
  0xb8   : > { %v186_v19 = vpop.xlane.xlu0 %185 }
  0xb9   : > { %v188_v21 = vmul.f32 0.015625, %v186_v19 }
  0xbb   : > { %v190_v22 = vsub.f32 %v188_v21, %v189_v20 }
  0xbd   : > { %v191_v23 = vmax.f32 %v190_v22, 0.0 }
  0xbf   : > { %v192_v24 = vadd.f32 1e-08, %v191_v23 }
  0xc1   : > { %337 = vrsqrt.f32 %v192_v24 }
  0xcb   : > { %v338_v26 = vpop.eup %337 }
  0xcc   : > { %v196_v27 = vmul.f32 %v338_v26, %v194_v25 }
  0xce   : > { %201 = vperm.xlu1 %335, %v196_v27   ;;  %v197_v29 = vmul.f32 %v196_v27, %v187_v18 }
  0xd0   : > { %v198_v30 = vsub.f32 %v195_v28, %v197_v29 }
  0xd2   : > { %207 = vperm.xlu1 %335, %v198_v30  }
 0x14d   : > { %v202_v31 = vpop.permute.xlu1 %201 }
 0x14e   : > { %v204_v32 = vmul.f32 %v202_v31, %v166_v0 }
 0x151   : > { %v208_v33 = vpop.permute.xlu1 %207 }
 0x152   : > { %v210_v34 = vadd.f32 %v208_v33, %v204_v32 }
 0x154   : > { %211 = vst [vmem:[%s161_s9] sm:$0xf] %v210_v34 }
 0x155   : > { %352 = shalt.err (!%p349_p3)
}
 0x156   : > { %s353_s27 = scalar_lea.hbm %s489_s19, 64  ;;  %s357_s30 = scalar_lea.hbm %s534_s3, 128 }
 0x157   : > { %p354_p4 = scmp.ne.s32.totalorder %s489_s19, %s353_s27  ;;  %p358_p9 = scmp.lt.u32.totalorder %s489_s19, %s534_s3 }
 0x158   : > { %p359_p10 = scmp.lt.u32.totalorder %s357_s30, %s353_s27  ;;  %p361_p12 = scmp.lt.u32.totalorder %s353_s27, %s489_s19 }
 0x159   : > { %p355_p7 = pnand %p354_p4, %p463_p5 }
 0x15a   : > { %p360_p11 = por %p359_p10, %p358_p9 }
 0x15b   : > { %p356_p8 = pneg %p355_p7 }
 0x15c   : > { %p362_p13 = por %p361_p12, %p360_p11 }
 0x15e   : > { %p363_p0 = pnand %p362_p13, %p356_p8 }
 0x160   : > { %366 = shalt.err (!%p363_p0)
}
 0x161   : > { %295 = dma.vmem_to_hbm [thread:$0]  (%p463_p5), %s491_s10, 64, %s489_s19, %s213_s20  }
 0x162 PF: > { %p301_p1 = scmp.ge.s32.totalorder %s401_s15, 2  ;;  %s238_s6 = sand.u32 1, %s389_s12  }
 0x163   : > { %s239_s7 = scalar_lea.sflag [#allocation3], %s238_s6 }
 0x164   : > { %p298_p2 = pnand %p301_p1, %p467_p6 }
 0x166   : > { %384 = dma.done.wait (!%p298_p2), %s239_s7, 64  }
 0x167   : > { %386 = vsyncadd (!%p298_p2), %s239_s7, 4294967232  ;;  %p13_p3 = scmp.ge.s32.totalorder %s450_s18, 4   ;;  %s537_s12 = smov %s393_s13 }
 0x168   : > { %s538_s13 = smov %s397_s14  ;;  %s539_s14 = smov %s461_s21 }
 0x169   : > { %s540_s15 = smov %s450_s18  ;;  %15 = sbr.rel (!%p13_p3) target bundleno = 3 (0x3), region = 67 }
 0x170   :  { %244 = vsyncpa [#allocation3], 1 }
 0x171   :  { %246 = vsyncpa [#allocation3 + $0x1], 1 }

</bundles_post_ra>
